<compile_context>
chip_gen: v7x
topology: tpu7x:2x2x1
jax: 0.10.0
libtpu: 0.0.40
codegen_flags: <defaults>
</compile_context>

<pallas_src>
import functools

import jax
import jax.numpy as jnp
from jax.experimental import pallas as pl
from jax.experimental.pallas import tpu as pltpu


def _pair(v):
    return (v, v) if isinstance(v, int) else tuple(v)


def _round_up(a, b):
    return ((a + b - 1) // b) * b


# ----------------------------- Pallas kernel ------------------------------- #

def _fused_conv_kernel(x_ref, w_ref, b_ref, o_ref, slab_ref, *,
                       tap_shifts, cin, s_out, nb):
    """One grid step = `nb` images, one fused MXU matmul.

    x_ref    : (nb, Cin, L_in)        zero-padded images, flat spatial on lanes
    w_ref    : (Cout, Cin*KH*KW)      fused weights, resident in VMEM
    b_ref    : (Cout, 1)              f32 bias column
    o_ref    : (nb, Cout, s_out)      stride-1 outputs, flat spatial on lanes
    slab_ref : (Cin*KH*KW, nb*s_out)  VMEM scratch holding the stacked taps
    """
    # Stack every tap window of every image along the contraction (sublane)
    # axis.  All offsets are static, so these are plain vector copies that can
    # overlap with the previous step's MXU work / DMAs.
    for i in range(nb):
        for t, shift in enumerate(tap_shifts):
            slab_ref[pl.ds(t * cin, cin), pl.ds(i * s_out, s_out)] = (
                x_ref[i, :, pl.ds(shift, s_out)])

    # Single MXU matmul with K = Cin*KH*KW (instead of KH*KW tiny K=Cin dots);
    # f32 accumulation regardless of the operand dtype.
    acc = jnp.dot(w_ref[...], slab_ref[...],
                  preferred_element_type=jnp.float32)
    acc = acc + b_ref[...]

    for i in range(nb):  # static, lane-aligned slices (s_out % 128 == 0)
        o_ref[i, :, :] = acc[:, i * s_out:(i + 1) * s_out].astype(o_ref.dtype)


# ------------------------------ Conv wrapper -------------------------------- #

def meta_conv2d_forward(x, weight, bias, *, stride=(1, 1), padding=(1, 1),
                        dilation=(1, 1), groups=1, use_bf16_matmul=False):
    """Equivalent of F.conv2d(x, weight, bias, stride, padding, dilation, groups)."""
    assert groups == 1, "only groups=1 supported"  # TODO(synk): grouped conv

    (sh, sw), (ph, pw), (dh, dw) = _pair(stride), _pair(padding), _pair(dilation)
    N, Cin, H, W = x.shape
    Cout, Cin_w, KH, KW = weight.shape
    assert Cin == Cin_w

    # Explicit/opt-in precision handling (review correctness note): default
    # path keeps the promoted input/weight dtype end-to-end.
    out_dtype = jnp.promote_types(x.dtype, weight.dtype)
    compute_dtype = jnp.bfloat16 if use_bf16_matmul else out_dtype

    Hp, Wp = H + 2 * ph, W + 2 * pw
    # Stride-1 output extent; stride>1 output is the stride-1 output
    # subsampled.  TODO(synk): native strided fast path (saves sh*sw compute).
    H1 = Hp - dh * (KH - 1)
    W1 = Wp - dw * (KW - 1)
    Hout = (H1 - 1) // sh + 1
    Wout = (W1 - 1) // sw + 1

    # Flat spatial positions per image: H1 rows of width Wp (rightmost Wp-W1
    # columns of each row are garbage, cropped later).  Round up to 128 lanes.
    s_need = H1 * Wp
    s_out = _round_up(s_need, 128)

    # Grow the bottom zero padding so the furthest tap slice stays in bounds.
    max_shift = (KH - 1) * dh * Wp + (KW - 1) * dw
    extra_rows = max(0, -(-(s_out + max_shift - Hp * Wp) // Wp))   # ceil, >= 0
    x_pad = jnp.pad(x, ((0, 0), (0, 0), (ph, ph + extra_rows), (pw, pw)))
    L_in = (Hp + extra_rows) * Wp
    x_flat = x_pad.reshape(N, Cin, L_in).astype(compute_dtype)
    # TODO(synk): move the zero padding into the kernel (DMA unpadded rows into
    # a zero-filled VMEM scratch) to remove this extra HBM round-trip on v5e.

    # Fused weight matrix (Cout, K) with K ordered (kh, kw, cin) to match the
    # stacked slab layout (row = t*Cin + c, t = kh*KW + kw).
    K = Cin * KH * KW
    w_fused = jnp.transpose(weight, (0, 2, 3, 1)).reshape(Cout, K)
    w_fused = w_fused.astype(compute_dtype)
    if bias is None:
        b_col = jnp.zeros((Cout, 1), dtype=jnp.float32)
    else:
        b_col = bias.reshape(Cout, 1).astype(jnp.float32)
    tap_shifts = tuple(kh * dh * Wp + kw * dw
                       for kh in range(KH) for kw in range(KW))

    # ---- Generation-aware VMEM budget & images-per-step choice ------------ #
    try:
        vmem_cap = int(pltpu.get_tpu_info().vmem_capacity_bytes)
    except Exception:                           # fallback: assume v7x (64 MiB)
        vmem_cap = 64 << 20
    budget = (vmem_cap * 3) // 4                # ~48 MiB v7x, ~96 MiB v5e/v6e

    comp_isz = jnp.dtype(compute_dtype).itemsize
    out_isz = jnp.dtype(out_dtype).itemsize

    def vmem_est(nb):
        return (2 * nb * Cin * L_in * comp_isz        # double-buffered input
                + 2 * nb * Cout * s_out * out_isz     # double-buffered output
                + 2 * (Cout * K * comp_isz + Cout * 4)  # weights + bias
                + K * nb * s_out * comp_isz)          # stacked-tap scratch

    # Fold images so each matmul has ~2k output lanes (amortizes per-step
    # pipeline overhead for small images); nb must divide N and fit in VMEM.
    nb = max(1, min(N, 2048 // max(s_out, 1)))
    while nb > 1 and (N % nb != 0 or vmem_est(nb) > budget - (8 << 20)):
        nb -= 1
    # TODO(synk): for large Cin*H*W add a second "parallel" grid axis over
    # spatial bands instead (keeps both v7x TensorCores busy, bounds VMEM).

    vmem_limit = int(min(max(vmem_est(nb) + (8 << 20), 32 << 20), budget))

    kernel = functools.partial(_fused_conv_kernel, tap_shifts=tap_shifts,
                               cin=Cin, s_out=s_out, nb=nb)

    out_flat = pl.pallas_call(
        kernel,
        out_shape=jax.ShapeDtypeStruct((N, Cout, s_out), out_dtype),
        grid_spec=pltpu.PrefetchScalarGridSpec(
            num_scalar_prefetch=0,
            grid=(N // nb,),
            in_specs=[
                pl.BlockSpec((nb, Cin, L_in), lambda n: (n, 0, 0)),
                # TODO(synk): pipeline_mode=pl.Buffered(1) for these two
                # grid-invariant blocks to drop the duplicate VMEM buffer.
                pl.BlockSpec((Cout, K), lambda n: (0, 0)),
                pl.BlockSpec((Cout, 1), lambda n: (0, 0)),
            ],
            out_specs=pl.BlockSpec((nb, Cout, s_out), lambda n: (n, 0, 0)),
            scratch_shapes=[pltpu.VMEM((K, nb * s_out), compute_dtype)],
        ),
        compiler_params=pltpu.CompilerParams(
            dimension_semantics=("parallel",),     # shard batch blocks over TCs
            vmem_limit_bytes=vmem_limit),
    )(x_flat, w_fused, b_col)

    # Crop garbage columns / subsample for stride (cheap XLA slice).
    # TODO(synk): write only valid columns / native strided store in-kernel.
    out = out_flat[:, :, :H1 * Wp].reshape(N, Cout, H1, Wp)
    out = out[:, :, ::sh, ::sw][:, :, :Hout, :Wout]
    return out


# --------------------------------- main ------------------------------------ #

if __name__ == "__main__":
    # MetaConv2d(in_channels=4, out_channels=8, kernel_size=3, stride=1,
    #            padding=1, bias=True)
    key = jax.random.PRNGKey(0)
    kx, kw_, kb = jax.random.split(key, 3)

    N, Cin, H, W = 2, 4, 16, 16
    Cout, KH, KW = 8, 3, 3
    stride, padding, dilation, groups = (1, 1), (1, 1), (1, 1), 1

    x = jax.random.normal(kx, (N, Cin, H, W), dtype=jnp.float32)
    # Deterministic init matching nn.Conv2d fan_in-based uniform bound.
    fan_in = Cin * KH * KW
    bound = 1.0 / (fan_in ** 0.5)
    weight = jax.random.uniform(kw_, (Cout, Cin, KH, KW), jnp.float32,
                                minval=-bound, maxval=bound)
    bias = jax.random.uniform(kb, (Cout,), jnp.float32,
                              minval=-bound, maxval=bound)

    fwd = jax.jit(functools.partial(meta_conv2d_forward, stride=stride,
                                    padding=padding, dilation=dilation,
                                    groups=groups))
    out = jax.block_until_ready(fwd(x, weight, bias))

    # Reference check against XLA's conv (same semantics as F.conv2d).
    ref = jax.lax.conv_general_dilated(
        x, weight, window_strides=stride,
        padding=[(padding[0], padding[0]), (padding[1], padding[1])],
        rhs_dilation=dilation, dimension_numbers=("NCHW", "OIHW", "NCHW"))
    ref = ref + bias.reshape(1, Cout, 1, 1)
    assert out.shape == ref.shape == (N, Cout, H, W)
    assert jnp.allclose(out, ref, atol=1e-4, rtol=1e-4), (
        float(jnp.max(jnp.abs(out - ref))))

    print("KERNEL_OK")
</pallas_src>

<mosaic_0001>
module attributes {stable_mosaic.version = 11 : i64} {
  func.func @_fused_conv_kernel(%arg0: i32, %arg1: memref<2x4x432xf32, #tpu.memory_space<vmem>>, %arg2: memref<8x36xf32, #tpu.memory_space<vmem>>, %arg3: memref<8x1xf32, #tpu.memory_space<vmem>>, %arg4: memref<2x8x384xf32, #tpu.memory_space<vmem>>, %arg5: memref<36x768xf32, #tpu.memory_space<vmem>>) attributes {dimension_semantics = [#tpu.dimension_semantics<parallel>], iteration_bounds = array<i64: 1>, scalar_prefetch = 0 : i64, scratch_operands = 1 : i64, tpu.core_type = #tpu.core_type<tc>, window_params = [{transform_indices = @transform_0, window_bounds = array<i64: 2, 4, 432>}, {pipeline_mode = #tpu.pipeline_mode<synchronous>, transform_indices = @transform_1, window_bounds = array<i64: 8, 36>}, {pipeline_mode = #tpu.pipeline_mode<synchronous>, transform_indices = @transform_2, window_bounds = array<i64: 8, 1>}, {transform_indices = @transform_3, window_bounds = array<i64: 2, 8, 384>}]} {
    %c0 = arith.constant 0 : index
    %c0_0 = arith.constant 0 : index
    %c0_1 = arith.constant 0 : index
    %0 = vector.load %arg1[%c0, %c0_0, %c0_1] : memref<2x4x432xf32, #tpu.memory_space<vmem>>, vector<1x4x384xf32>
    %1 = vector.shape_cast %0 : vector<1x4x384xf32> to vector<4x384xf32>
    %c0_2 = arith.constant 0 : index
    %c0_3 = arith.constant 0 : index
    %2 = vector.load %arg5[%c0_2, %c0_3] : memref<36x768xf32, #tpu.memory_space<vmem>>, vector<4x384xf32>
    tpu.vector_store %arg5[%c0_2, %c0_3], %1 {strides = array<i32>} : memref<36x768xf32, #tpu.memory_space<vmem>>, vector<4x384xf32>,
    %c0_4 = arith.constant 0 : index
    %c0_5 = arith.constant 0 : index
    %c1 = arith.constant 1 : index
    %3 = vector.load %arg1[%c0_4, %c0_5, %c1] : memref<2x4x432xf32, #tpu.memory_space<vmem>>, vector<1x4x384xf32>
    %4 = vector.shape_cast %3 : vector<1x4x384xf32> to vector<4x384xf32>
    %c4 = arith.constant 4 : index
    %c0_6 = arith.constant 0 : index
    %5 = vector.load %arg5[%c4, %c0_6] : memref<36x768xf32, #tpu.memory_space<vmem>>, vector<4x384xf32>
    tpu.vector_store %arg5[%c4, %c0_6], %4 {strides = array<i32>} : memref<36x768xf32, #tpu.memory_space<vmem>>, vector<4x384xf32>,
    %c0_7 = arith.constant 0 : index
    %c0_8 = arith.constant 0 : index
    %c2 = arith.constant 2 : index
    %6 = vector.load %arg1[%c0_7, %c0_8, %c2] : memref<2x4x432xf32, #tpu.memory_space<vmem>>, vector<1x4x384xf32>
    %7 = vector.shape_cast %6 : vector<1x4x384xf32> to vector<4x384xf32>
    %c8 = arith.constant 8 : index
    %c0_9 = arith.constant 0 : index
    %8 = vector.load %arg5[%c8, %c0_9] : memref<36x768xf32, #tpu.memory_space<vmem>>, vector<4x384xf32>
    tpu.vector_store %arg5[%c8, %c0_9], %7 {strides = array<i32>} : memref<36x768xf32, #tpu.memory_space<vmem>>, vector<4x384xf32>,
    %c0_10 = arith.constant 0 : index
    %c0_11 = arith.constant 0 : index
    %c18 = arith.constant 18 : index
    %9 = vector.load %arg1[%c0_10, %c0_11, %c18] : memref<2x4x432xf32, #tpu.memory_space<vmem>>, vector<1x4x384xf32>
    %10 = vector.shape_cast %9 : vector<1x4x384xf32> to vector<4x384xf32>
    %c12 = arith.constant 12 : index
    %c0_12 = arith.constant 0 : index
    %11 = vector.load %arg5[%c12, %c0_12] : memref<36x768xf32, #tpu.memory_space<vmem>>, vector<4x384xf32>
    tpu.vector_store %arg5[%c12, %c0_12], %10 {strides = array<i32>} : memref<36x768xf32, #tpu.memory_space<vmem>>, vector<4x384xf32>,
    %c0_13 = arith.constant 0 : index
    %c0_14 = arith.constant 0 : index
    %c19 = arith.constant 19 : index
    %12 = vector.load %arg1[%c0_13, %c0_14, %c19] : memref<2x4x432xf32, #tpu.memory_space<vmem>>, vector<1x4x384xf32>
    %13 = vector.shape_cast %12 : vector<1x4x384xf32> to vector<4x384xf32>
    %c16 = arith.constant 16 : index
    %c0_15 = arith.constant 0 : index
    %14 = vector.load %arg5[%c16, %c0_15] : memref<36x768xf32, #tpu.memory_space<vmem>>, vector<4x384xf32>
    tpu.vector_store %arg5[%c16, %c0_15], %13 {strides = array<i32>} : memref<36x768xf32, #tpu.memory_space<vmem>>, vector<4x384xf32>,
    %c0_16 = arith.constant 0 : index
    %c0_17 = arith.constant 0 : index
    %c20 = arith.constant 20 : index
    %15 = vector.load %arg1[%c0_16, %c0_17, %c20] : memref<2x4x432xf32, #tpu.memory_space<vmem>>, vector<1x4x384xf32>
    %16 = vector.shape_cast %15 : vector<1x4x384xf32> to vector<4x384xf32>
    %c20_18 = arith.constant 20 : index
    %c0_19 = arith.constant 0 : index
    %17 = vector.load %arg5[%c20_18, %c0_19] : memref<36x768xf32, #tpu.memory_space<vmem>>, vector<4x384xf32>
    tpu.vector_store %arg5[%c20_18, %c0_19], %16 {strides = array<i32>} : memref<36x768xf32, #tpu.memory_space<vmem>>, vector<4x384xf32>,
    %c0_20 = arith.constant 0 : index
    %c0_21 = arith.constant 0 : index
    %c36 = arith.constant 36 : index
    %18 = vector.load %arg1[%c0_20, %c0_21, %c36] : memref<2x4x432xf32, #tpu.memory_space<vmem>>, vector<1x4x384xf32>
    %19 = vector.shape_cast %18 : vector<1x4x384xf32> to vector<4x384xf32>
    %c24 = arith.constant 24 : index
    %c0_22 = arith.constant 0 : index
    %20 = vector.load %arg5[%c24, %c0_22] : memref<36x768xf32, #tpu.memory_space<vmem>>, vector<4x384xf32>
    tpu.vector_store %arg5[%c24, %c0_22], %19 {strides = array<i32>} : memref<36x768xf32, #tpu.memory_space<vmem>>, vector<4x384xf32>,
    %c0_23 = arith.constant 0 : index
    %c0_24 = arith.constant 0 : index
    %c37 = arith.constant 37 : index
    %21 = vector.load %arg1[%c0_23, %c0_24, %c37] : memref<2x4x432xf32, #tpu.memory_space<vmem>>, vector<1x4x384xf32>
    %22 = vector.shape_cast %21 : vector<1x4x384xf32> to vector<4x384xf32>
    %c28 = arith.constant 28 : index
    %c0_25 = arith.constant 0 : index
    %23 = vector.load %arg5[%c28, %c0_25] : memref<36x768xf32, #tpu.memory_space<vmem>>, vector<4x384xf32>
    tpu.vector_store %arg5[%c28, %c0_25], %22 {strides = array<i32>} : memref<36x768xf32, #tpu.memory_space<vmem>>, vector<4x384xf32>,
    %c0_26 = arith.constant 0 : index
    %c0_27 = arith.constant 0 : index
    %c38 = arith.constant 38 : index
    %24 = vector.load %arg1[%c0_26, %c0_27, %c38] : memref<2x4x432xf32, #tpu.memory_space<vmem>>, vector<1x4x384xf32>
    %25 = vector.shape_cast %24 : vector<1x4x384xf32> to vector<4x384xf32>
    %c32 = arith.constant 32 : index
    %c0_28 = arith.constant 0 : index
    %26 = vector.load %arg5[%c32, %c0_28] : memref<36x768xf32, #tpu.memory_space<vmem>>, vector<4x384xf32>
    tpu.vector_store %arg5[%c32, %c0_28], %25 {strides = array<i32>} : memref<36x768xf32, #tpu.memory_space<vmem>>, vector<4x384xf32>,
    %c1_29 = arith.constant 1 : index
    %c0_30 = arith.constant 0 : index
    %c0_31 = arith.constant 0 : index
    %27 = vector.load %arg1[%c1_29, %c0_30, %c0_31] : memref<2x4x432xf32, #tpu.memory_space<vmem>>, vector<1x4x384xf32>
    %28 = vector.shape_cast %27 : vector<1x4x384xf32> to vector<4x384xf32>
    %c0_32 = arith.constant 0 : index
    %c384 = arith.constant 384 : index
    %29 = vector.load %arg5[%c0_32, %c384] : memref<36x768xf32, #tpu.memory_space<vmem>>, vector<4x384xf32>
    tpu.vector_store %arg5[%c0_32, %c384], %28 {strides = array<i32>} : memref<36x768xf32, #tpu.memory_space<vmem>>, vector<4x384xf32>,
    %c1_33 = arith.constant 1 : index
    %c0_34 = arith.constant 0 : index
    %c1_35 = arith.constant 1 : index
    %30 = vector.load %arg1[%c1_33, %c0_34, %c1_35] : memref<2x4x432xf32, #tpu.memory_space<vmem>>, vector<1x4x384xf32>
    %31 = vector.shape_cast %30 : vector<1x4x384xf32> to vector<4x384xf32>
    %c4_36 = arith.constant 4 : index
    %c384_37 = arith.constant 384 : index
    %32 = vector.load %arg5[%c4_36, %c384_37] : memref<36x768xf32, #tpu.memory_space<vmem>>, vector<4x384xf32>
    tpu.vector_store %arg5[%c4_36, %c384_37], %31 {strides = array<i32>} : memref<36x768xf32, #tpu.memory_space<vmem>>, vector<4x384xf32>,
    %c1_38 = arith.constant 1 : index
    %c0_39 = arith.constant 0 : index
    %c2_40 = arith.constant 2 : index
    %33 = vector.load %arg1[%c1_38, %c0_39, %c2_40] : memref<2x4x432xf32, #tpu.memory_space<vmem>>, vector<1x4x384xf32>
    %34 = vector.shape_cast %33 : vector<1x4x384xf32> to vector<4x384xf32>
    %c8_41 = arith.constant 8 : index
    %c384_42 = arith.constant 384 : index
    %35 = vector.load %arg5[%c8_41, %c384_42] : memref<36x768xf32, #tpu.memory_space<vmem>>, vector<4x384xf32>
    tpu.vector_store %arg5[%c8_41, %c384_42], %34 {strides = array<i32>} : memref<36x768xf32, #tpu.memory_space<vmem>>, vector<4x384xf32>,
    %c1_43 = arith.constant 1 : index
    %c0_44 = arith.constant 0 : index
    %c18_45 = arith.constant 18 : index
    %36 = vector.load %arg1[%c1_43, %c0_44, %c18_45] : memref<2x4x432xf32, #tpu.memory_space<vmem>>, vector<1x4x384xf32>
    %37 = vector.shape_cast %36 : vector<1x4x384xf32> to vector<4x384xf32>
    %c12_46 = arith.constant 12 : index
    %c384_47 = arith.constant 384 : index
    %38 = vector.load %arg5[%c12_46, %c384_47] : memref<36x768xf32, #tpu.memory_space<vmem>>, vector<4x384xf32>
    tpu.vector_store %arg5[%c12_46, %c384_47], %37 {strides = array<i32>} : memref<36x768xf32, #tpu.memory_space<vmem>>, vector<4x384xf32>,
    %c1_48 = arith.constant 1 : index
    %c0_49 = arith.constant 0 : index
    %c19_50 = arith.constant 19 : index
    %39 = vector.load %arg1[%c1_48, %c0_49, %c19_50] : memref<2x4x432xf32, #tpu.memory_space<vmem>>, vector<1x4x384xf32>
    %40 = vector.shape_cast %39 : vector<1x4x384xf32> to vector<4x384xf32>
    %c16_51 = arith.constant 16 : index
    %c384_52 = arith.constant 384 : index
    %41 = vector.load %arg5[%c16_51, %c384_52] : memref<36x768xf32, #tpu.memory_space<vmem>>, vector<4x384xf32>
    tpu.vector_store %arg5[%c16_51, %c384_52], %40 {strides = array<i32>} : memref<36x768xf32, #tpu.memory_space<vmem>>, vector<4x384xf32>,
    %c1_53 = arith.constant 1 : index
    %c0_54 = arith.constant 0 : index
    %c20_55 = arith.constant 20 : index
    %42 = vector.load %arg1[%c1_53, %c0_54, %c20_55] : memref<2x4x432xf32, #tpu.memory_space<vmem>>, vector<1x4x384xf32>
    %43 = vector.shape_cast %42 : vector<1x4x384xf32> to vector<4x384xf32>
    %c20_56 = arith.constant 20 : index
    %c384_57 = arith.constant 384 : index
    %44 = vector.load %arg5[%c20_56, %c384_57] : memref<36x768xf32, #tpu.memory_space<vmem>>, vector<4x384xf32>
    tpu.vector_store %arg5[%c20_56, %c384_57], %43 {strides = array<i32>} : memref<36x768xf32, #tpu.memory_space<vmem>>, vector<4x384xf32>,
    %c1_58 = arith.constant 1 : index
    %c0_59 = arith.constant 0 : index
    %c36_60 = arith.constant 36 : index
    %45 = vector.load %arg1[%c1_58, %c0_59, %c36_60] : memref<2x4x432xf32, #tpu.memory_space<vmem>>, vector<1x4x384xf32>
    %46 = vector.shape_cast %45 : vector<1x4x384xf32> to vector<4x384xf32>
    %c24_61 = arith.constant 24 : index
    %c384_62 = arith.constant 384 : index
    %47 = vector.load %arg5[%c24_61, %c384_62] : memref<36x768xf32, #tpu.memory_space<vmem>>, vector<4x384xf32>
    tpu.vector_store %arg5[%c24_61, %c384_62], %46 {strides = array<i32>} : memref<36x768xf32, #tpu.memory_space<vmem>>, vector<4x384xf32>,
    %c1_63 = arith.constant 1 : index
    %c0_64 = arith.constant 0 : index
    %c37_65 = arith.constant 37 : index
    %48 = vector.load %arg1[%c1_63, %c0_64, %c37_65] : memref<2x4x432xf32, #tpu.memory_space<vmem>>, vector<1x4x384xf32>
    %49 = vector.shape_cast %48 : vector<1x4x384xf32> to vector<4x384xf32>
    %c28_66 = arith.constant 28 : index
    %c384_67 = arith.constant 384 : index
    %50 = vector.load %arg5[%c28_66, %c384_67] : memref<36x768xf32, #tpu.memory_space<vmem>>, vector<4x384xf32>
    tpu.vector_store %arg5[%c28_66, %c384_67], %49 {strides = array<i32>} : memref<36x768xf32, #tpu.memory_space<vmem>>, vector<4x384xf32>,
    %c1_68 = arith.constant 1 : index
    %c0_69 = arith.constant 0 : index
    %c38_70 = arith.constant 38 : index
    %51 = vector.load %arg1[%c1_68, %c0_69, %c38_70] : memref<2x4x432xf32, #tpu.memory_space<vmem>>, vector<1x4x384xf32>
    %52 = vector.shape_cast %51 : vector<1x4x384xf32> to vector<4x384xf32>
    %c32_71 = arith.constant 32 : index
    %c384_72 = arith.constant 384 : index
    %53 = vector.load %arg5[%c32_71, %c384_72] : memref<36x768xf32, #tpu.memory_space<vmem>>, vector<4x384xf32>
    tpu.vector_store %arg5[%c32_71, %c384_72], %52 {strides = array<i32>} : memref<36x768xf32, #tpu.memory_space<vmem>>, vector<4x384xf32>,
    %c0_73 = arith.constant 0 : index
    %c0_74 = arith.constant 0 : index
    %54 = vector.load %arg2[%c0_73, %c0_74] : memref<8x36xf32, #tpu.memory_space<vmem>>, vector<8x36xf32>
    %c0_75 = arith.constant 0 : index
    %c0_76 = arith.constant 0 : index
    %55 = vector.load %arg5[%c0_75, %c0_76] : memref<36x768xf32, #tpu.memory_space<vmem>>, vector<36x768xf32>
    %cst = arith.constant dense<0.000000e+00> : vector<8x768xf32>
    %56 = tpu.matmul %54, %55, %cst {dimension_numbers = #tpu.dot_dimension_numbers<[1], [0], [0], [1], [0, 0, 1, 1], [], []>} : vector<8x36xf32>, vector<36x768xf32>, vector<8x768xf32> -> vector<8x768xf32>
    %c0_77 = arith.constant 0 : index
    %c0_78 = arith.constant 0 : index
    %57 = vector.load %arg3[%c0_77, %c0_78] : memref<8x1xf32, #tpu.memory_space<vmem>>, vector<8x1xf32>
    %58 = vector.broadcast %57 : vector<8x1xf32> to vector<8x768xf32>
    %59 = arith.addf %56, %58 : vector<8x768xf32>
    %60 = vector.extract_strided_slice %59 {offsets = [0, 0], sizes = [8, 384], strides = [1, 1]} : vector<8x768xf32> to vector<8x384xf32>
    %c0_79 = arith.constant 0 : index
    %c0_80 = arith.constant 0 : index
    %c0_81 = arith.constant 0 : index
    %61 = vector.load %arg4[%c0_79, %c0_80, %c0_81] : memref<2x8x384xf32, #tpu.memory_space<vmem>>, vector<1x8x384xf32>
    %62 = vector.shape_cast %61 : vector<1x8x384xf32> to vector<8x384xf32>
    %63 = vector.shape_cast %60 : vector<8x384xf32> to vector<1x8x384xf32>
    tpu.vector_store %arg4[%c0_79, %c0_80, %c0_81], %63 {strides = array<i32>} : memref<2x8x384xf32, #tpu.memory_space<vmem>>, vector<1x8x384xf32>,
    %64 = vector.extract_strided_slice %59 {offsets = [0, 384], sizes = [8, 384], strides = [1, 1]} : vector<8x768xf32> to vector<8x384xf32>
    %c1_82 = arith.constant 1 : index
    %c0_83 = arith.constant 0 : index
    %c0_84 = arith.constant 0 : index
    %65 = vector.load %arg4[%c1_82, %c0_83, %c0_84] : memref<2x8x384xf32, #tpu.memory_space<vmem>>, vector<1x8x384xf32>
    %66 = vector.shape_cast %65 : vector<1x8x384xf32> to vector<8x384xf32>
    %67 = vector.shape_cast %64 : vector<8x384xf32> to vector<1x8x384xf32>
    tpu.vector_store %arg4[%c1_82, %c0_83, %c0_84], %67 {strides = array<i32>} : memref<2x8x384xf32, #tpu.memory_space<vmem>>, vector<1x8x384xf32>,
    return
  }
  func.func @transform_0(%arg0: i32) -> (i32, i32, i32) {
    %c0_i32 = arith.constant 0 : i32
    %c0_i32_0 = arith.constant 0 : i32
    %c0_i32_1 = arith.constant 0 : i32
    return %arg0, %c0_i32, %c0_i32_0 : i32, i32, i32
  }
  func.func @transform_1(%arg0: i32) -> (i32, i32) {
    %c0_i32 = arith.constant 0 : i32
    %c0_i32_0 = arith.constant 0 : i32
    %c0_i32_1 = arith.constant 0 : i32
    return %c0_i32, %c0_i32_0 : i32, i32
  }
  func.func @transform_2(%arg0: i32) -> (i32, i32) {
    %c0_i32 = arith.constant 0 : i32
    %c0_i32_0 = arith.constant 0 : i32
    %c0_i32_1 = arith.constant 0 : i32
    return %c0_i32, %c0_i32_0 : i32, i32
  }
  func.func @transform_3(%arg0: i32) -> (i32, i32, i32) {
    %c0_i32 = arith.constant 0 : i32
    %c0_i32_0 = arith.constant 0 : i32
    %c0_i32_1 = arith.constant 0 : i32
    return %arg0, %c0_i32, %c0_i32_0 : i32, i32, i32
  }
}

</mosaic_0001>

<bundles_post_ra>
// kernel: meta_conv2d_forward.1
= control target key start
LH: loop header
LB: loop body
LE: loop exit
PB: predicated region body
PF: predicated region fallthrough
CT: control target
= control target key end

     0   :  { %s764_s18 = smov 126   ;;  %s765_s19 = smov 127   ;;  %v772_v14 = vmov 0.0   ;;  %vm60_vm0 = vcmask 1031168   ;;  %vm36_vm1 = vcmask 1039360   ;;  %vm84_vm2 = vcmask 900096   ;;  %s1052_s0 = inlined_call_operand.vmem [shape: f32[2,4,432], index: 0, kind: input, shape index: {}]   ;;  %s1053_s2 = inlined_call_operand.vmem [shape: f32[8,1], index: 2, kind: input, shape index: {}]   ;;  %s1054_s1 = inlined_call_operand.vmem [shape: f32[8,36], index: 1, kind: input, shape index: {}]   ;;  %s1055_s3 = inlined_call_operand.vmem [shape: f32[2,8,384], index: 3, kind: output, shape index: {}]  }
   0x1   :  { %v797_v0 = vld [vmem:[%s1052_s0 + $0x8] sm:$0xff]  ;;  %v802_v1 = vld [vmem:[%s1052_s0] sm:$0xff]  ;;  %v807_v2 = vld [vmem:[%s1052_s0 + $0x10] sm:$0xff]  ;;  %s766_s20 = smov 110   ;;  %s767_s21 = smov 109   ;;  %531 = vmatprep.mubr.f32.mxu0 %v772_v14  ;;  %602 = vmatprep.mubr.f32.mxu1 %v772_v14  ;;  %v773_v24 = vmov 0  }
   0x2   :  { %56 = vrot.lane.b32.xlu1 %v797_v0, %s764_s18  ;;  %30 = vrot.lane.b32.xlu0 %v802_v1, %s765_s19  ;;  %v50_v3 = vcombine.high %v802_v1, %v802_v1  ;;  %19 = vst [vmem:[#allocation2] sm:$0xf] %v802_v1  ;;  %220 = vst [vmem:[#allocation2 + $0x18] sm:$0xf] %v807_v2  ;;  %v27_v4 = vcombine.low %v797_v0, %v797_v0  ;;  %s768_s22 = smov 108   ;;  %s769_s23 = smov 92  }
   0x3   :  { %v821_v5 = vcombine.high %v807_v2, %v807_v2  ;;  %v26_v6 = vcombine.low %v802_v1, %v802_v1  ;;  %s770_s24 = smov 91   ;;  %v692_v7 = vld [vmem:[%s1052_s0 + $0x18] sm:$0xf]  ;;  %s771_s27 = smov 90   ;;  %v227_v8 = vcombine.low %v807_v2, %v807_v2  ;;  %v15_v11 = vld [vmem:[%s1052_s0 + $0x8] sm:$0xf]  ;;  %v51_v13 = vcombine.high %v797_v0, %v797_v0  ;;  %755 = vset.pattern.permute.xlu0 %v773_v24 }
   0x4   :  { %20 = vst [vmem:[#allocation2 + $0x8] sm:$0xf] %v50_v3  ;;  %222 = vst [vmem:[#allocation2 + $0x28] sm:$0xf] %v692_v7  ;;  %v694_v9 = vld [vmem:[%s1052_s0 + $0x18] sm:$0xff]  ;;  %v438_v25 = vld [vmem:[%s1053_s2] sm:$0xff] }
   0x5   :  { %221 = vst [vmem:[#allocation2 + $0x20] sm:$0xf] %v821_v5  ;;  %v228_v10 = vcombine.low %v694_v9, %v694_v9  ;;  %v251_v12 = vcombine.high %v694_v9, %v694_v9  ;;  %21 = vst [vmem:[#allocation2 + $0x10] sm:$0xf] %v15_v11  ;;  %vm108_vm3 = vcmask 891904   ;;  %vm132_vm4 = vcmask 883712  }
   0x6   :  { %54 = vrot.lane.b32.xlu1 %v50_v3, %s764_s18  ;;  %32 = vrot.lane.b32.xlu0 %v27_v4, %s765_s19  ;;  %vm156_vm5 = vcmask 752640   ;;  %vm180_vm6 = vcmask 744448   ;;  %vm204_vm7 = vcmask 736256   ;;  %vm448_vm8 = vcmask 1043456  }
   0x7   :  { %vm444_vm9 = vcmask 293888  }
   0xa   :  { %80 = vrot.lane.b32.xlu1 %v27_v4, %s766_s20  ;;  %78 = vrot.lane.b32.xlu0 %v802_v1, %s766_s20 }
   0xe   :  { %52 = vrot.lane.b32.xlu1 %v802_v1, %s764_s18  ;;  %28 = vrot.lane.b32.xlu0 %v26_v6, %s765_s19 }
  0x12   :  { %102 = vrot.lane.b32.xlu1 %v50_v3, %s767_s21  ;;  %76 = vrot.lane.b32.xlu0 %v26_v6, %s766_s20 }
  0x16   :  { %126 = vrot.lane.b32.xlu1 %v802_v1, %s768_s22  ;;  %104 = vrot.lane.b32.xlu0 %v797_v0, %s767_s21 }
  0x1a   :  { %150 = vrot.lane.b32.xlu1 %v50_v3, %s769_s23  ;;  %128 = vrot.lane.b32.xlu0 %v27_v4, %s768_s22 }
  0x1e   :  { %174 = vrot.lane.b32.xlu1 %v802_v1, %s770_s24  ;;  %152 = vrot.lane.b32.xlu0 %v797_v0, %s769_s23 }
  0x22   :  { %100 = vrot.lane.b32.xlu1 %v802_v1, %s767_s21  ;;  %176 = vrot.lane.b32.xlu0 %v27_v4, %s770_s24 }
  0x26   :  { %148 = vrot.lane.b32.xlu1 %v802_v1, %s769_s23  ;;  %124 = vrot.lane.b32.xlu0 %v26_v6, %s768_s22 }
  0x2a   :  { %198 = vrot.lane.b32.xlu1 %v50_v3, %s771_s27  ;;  %172 = vrot.lane.b32.xlu0 %v26_v6, %s770_s24 }
  0x2e   :  { %229 = vrot.lane.b32.xlu1 %v227_v8, %s765_s19  ;;  %200 = vrot.lane.b32.xlu0 %v797_v0, %s771_s27 }
  0x32   :  { %233 = vrot.lane.b32.xlu1 %v228_v10, %s765_s19  ;;  %231 = vrot.lane.b32.xlu0 %v807_v2, %s765_s19 }
  0x36   :  { %252 = vrot.lane.b32.xlu1 %v807_v2, %s764_s18  ;;  %235 = vrot.lane.b32.xlu0 %v694_v9, %s765_s19 }
  0x3a   :  { %256 = vrot.lane.b32.xlu1 %v694_v9, %s764_s18  ;;  %254 = vrot.lane.b32.xlu0 %v821_v5, %s764_s18 }
  0x3e   :  { %275 = vrot.lane.b32.xlu1 %v227_v8, %s766_s20  ;;  %258 = vrot.lane.b32.xlu0 %v251_v12, %s764_s18 }
  0x42   :  { %279 = vrot.lane.b32.xlu1 %v228_v10, %s766_s20  ;;  %277 = vrot.lane.b32.xlu0 %v807_v2, %s766_s20 }
  0x46   :  { %34 = vrot.lane.b32.xlu1 %v797_v0, %s765_s19  ;;  %281 = vrot.lane.b32.xlu0 %v694_v9, %s766_s20 }
  0x4a   :  { %82 = vrot.lane.b32.xlu1 %v797_v0, %s766_s20  ;;  %58 = vrot.lane.b32.xlu0 %v51_v13, %s764_s18 }
  0x4e   :  { %298 = vrot.lane.b32.xlu1 %v807_v2, %s767_s21  ;;  %196 = vrot.lane.b32.xlu0 %v802_v1, %s771_s27 }
  0x52   :  { %302 = vrot.lane.b32.xlu1 %v694_v9, %s767_s21  ;;  %300 = vrot.lane.b32.xlu0 %v821_v5, %s767_s21 }
  0x56   :  { %321 = vrot.lane.b32.xlu1 %v227_v8, %s768_s22  ;;  %304 = vrot.lane.b32.xlu0 %v251_v12, %s767_s21 }
  0x5a   :  { %325 = vrot.lane.b32.xlu1 %v228_v10, %s768_s22  ;;  %323 = vrot.lane.b32.xlu0 %v807_v2, %s768_s22 }
  0x5e   :  { %344 = vrot.lane.b32.xlu1 %v807_v2, %s769_s23  ;;  %327 = vrot.lane.b32.xlu0 %v694_v9, %s768_s22 }
  0x62   :  { %348 = vrot.lane.b32.xlu1 %v694_v9, %s769_s23  ;;  %346 = vrot.lane.b32.xlu0 %v821_v5, %s769_s23 }
  0x66   :  { %367 = vrot.lane.b32.xlu1 %v227_v8, %s770_s24  ;;  %350 = vrot.lane.b32.xlu0 %v251_v12, %s769_s23 }
  0x6a   :  { %371 = vrot.lane.b32.xlu1 %v228_v10, %s770_s24  ;;  %369 = vrot.lane.b32.xlu0 %v807_v2, %s770_s24 }
  0x6e   :  { %106 = vrot.lane.b32.xlu1 %v51_v13, %s767_s21  ;;  %373 = vrot.lane.b32.xlu0 %v694_v9, %s770_s24 }
  0x72   :  { %154 = vrot.lane.b32.xlu1 %v51_v13, %s769_s23  ;;  %130 = vrot.lane.b32.xlu0 %v797_v0, %s768_s22 }
  0x74   :  { %v920_v15 = vpop.permute.xlu1 %56  ;;  %v31_v16 = vpop.permute.xlu0 %30 }
  0x76   :  { %390 = vrot.lane.b32.xlu1 %v807_v2, %s771_s27  ;;  %178 = vrot.lane.b32.xlu0 %v797_v0, %s770_s24 }
  0x78   :  { %v55_v17 = vpop.permute.xlu1 %54  ;;  %v926_v18 = vpop.permute.xlu0 %32 }
  0x79   :  { %v62_v19 = vsel %vm60_vm0, %v55_v17, %v920_v15  ;;  %v38_v20 = vsel %vm36_vm1, %v31_v16, %v926_v18 }
  0x7a   :  { %68 = vst [vmem:[#allocation2 + $0x38] sm:$0xf] %v62_v19  ;;  %44 = vst [vmem:[#allocation2 + $0x8] sm:$0xf0] %v38_v20  ;;  %394 = vrot.lane.b32.xlu1 %v694_v9, %s771_s27  ;;  %392 = vrot.lane.b32.xlu0 %v821_v5, %s771_s27 }
  0x7c   :  { %v935_v21 = vpop.permute.xlu1 %80  ;;  %v79_v22 = vpop.permute.xlu0 %78 }
  0x7d   :  { %v86_v23 = vsel %vm84_vm2, %v79_v22, %v935_v21 }
  0x7e   :  { %92 = vst [vmem:[#allocation2 + $0x38] sm:$0xf0] %v86_v23  ;;  %202 = vrot.lane.b32.xlu1 %v51_v13, %s771_s27  ;;  %396 = vrot.lane.b32.xlu0 %v251_v12, %s771_s27 }
  0x80   :  { %v53_v26 = vpop.permute.xlu1 %52  ;;  %v29_v27 = vpop.permute.xlu0 %28 }
  0x81   :  { %v61_v28 = vsel %vm60_vm0, %v53_v26, %v55_v17  ;;  %v37_v29 = vsel %vm36_vm1, %v29_v27, %v31_v16  ;;  %v409_v33 = vld [vmem:[#allocation2 + $0x8] sm:$0xff] }
  0x82   :  { %67 = vst [vmem:[#allocation2 + $0x30] sm:$0xf] %v61_v28  ;;  %43 = vst [vmem:[#allocation2] sm:$0xf0] %v37_v29  ;;  %441 = vperm.xlu0 %755, %v438_v25  }
  0x84   :  { %v103_v30 = vpop.permute.xlu1 %102  ;;  %v77_v31 = vpop.permute.xlu0 %76 }
  0x85   :  { %v85_v32 = vsel %vm84_vm2, %v77_v31, %v79_v22  ;;  %v415_v34 = vld [vmem:[#allocation2 + $0x38] sm:$0xff] }
  0x86   :  { %91 = vst [vmem:[#allocation2 + $0x30] sm:$0xf0] %v85_v32  ;;  %v721_v35 = vpack.c.bf16 %v415_v34, %v409_v33 }
  0x88   :  { %v127_v36 = vpop.permute.xlu1 %126  ;;  %v947_v37 = vpop.permute.xlu0 %104  ;;  %722 = vmatprep.subr.bf16.mxu0 %v721_v35 }
  0x89   :  { %v110_v38 = vsel %vm108_vm3, %v103_v30, %v947_v37  ;;  %v408_v42 = vld [vmem:[#allocation2] sm:$0xff] }
  0x8a   :  { %116 = vst [vmem:[#allocation2 + $0x68] sm:$0xf] %v110_v38 }
  0x8c   :  { %v151_v39 = vpop.permute.xlu1 %150  ;;  %v951_v40 = vpop.permute.xlu0 %128 }
  0x8d   :  { %v134_v41 = vsel %vm132_vm4, %v127_v36, %v951_v40  ;;  %v414_v43 = vld [vmem:[#allocation2 + $0x30] sm:$0xff] }
  0x8e   :  { %140 = vst [vmem:[#allocation2 + $0x68] sm:$0xf0] %v134_v41  ;;  %v723_v44 = vpack.c.bf16 %v414_v43, %v408_v42 }
  0x90   :  { %v175_v45 = vpop.permute.xlu1 %174  ;;  %v955_v46 = vpop.permute.xlu0 %152  ;;  %724 = vmatpush1.bf16.msra.mxu0 %v723_v44 }
  0x91   :  { %v158_v47 = vsel %vm156_vm5, %v151_v39, %v955_v46 }
  0x92   :  { %164 = vst [vmem:[#allocation2 + $0x98] sm:$0xf] %v158_v47 }
  0x94   :  { %v101_v48 = vpop.permute.xlu1 %100  ;;  %v959_v49 = vpop.permute.xlu0 %176 }
  0x95   :  { %v109_v50 = vsel %vm108_vm3, %v101_v48, %v103_v30  ;;  %v182_v51 = vsel %vm180_vm6, %v175_v45, %v959_v49  ;;  %v421_v59 = vld [vmem:[#allocation2 + $0x68] sm:$0xff] }
  0x96   :  { %115 = vst [vmem:[#allocation2 + $0x60] sm:$0xf] %v109_v50  ;;  %188 = vst [vmem:[#allocation2 + $0x98] sm:$0xf0] %v182_v51 }
  0x98   :  { %v149_v52 = vpop.permute.xlu1 %148  ;;  %v125_v53 = vpop.permute.xlu0 %124 }
  0x99   :  { %v157_v54 = vsel %vm156_vm5, %v149_v52, %v151_v39  ;;  %v133_v55 = vsel %vm132_vm4, %v125_v53, %v127_v36 }
  0x9a   :  { %163 = vst [vmem:[#allocation2 + $0x90] sm:$0xf] %v157_v54  ;;  %139 = vst [vmem:[#allocation2 + $0x60] sm:$0xf0] %v133_v55  ;;  %v997_v54 = vld [vmem:[%s1054_s1] sm:$0xff] }
  0x9c   :  { %v966_v56 = vpop.permute.xlu1 %198  ;;  %v173_v57 = vpop.permute.xlu0 %172 }
  0x9d   :  { %v181_v58 = vsel %vm180_vm6, %v173_v57, %v175_v45  ;;  %v427_v60 = vld [vmem:[#allocation2 + $0x98] sm:$0xff] }
  0x9e   :  { %187 = vst [vmem:[#allocation2 + $0x90] sm:$0xf0] %v181_v58  ;;  %v725_v61 = vpack.c.bf16 %v427_v60, %v421_v59 }
  0xa0   :  { %v230_v62 = vpop.permute.xlu1 %229  ;;  %v969_v63 = vpop.permute.xlu0 %200  ;;  %726 = vmatprep.subr.bf16.mxu0 %v725_v61 }
  0xa1   :  { %v206_v0 = vsel %vm204_vm7, %v966_v56, %v969_v63  ;;  %v420_v5 = vld [vmem:[#allocation2 + $0x60] sm:$0xff] }
  0xa2   :  { %212 = vst [vmem:[#allocation2 + $0xc8] sm:$0xf] %v206_v0 }
  0xa4   :  { %v234_v1 = vpop.permute.xlu1 %233  ;;  %v232_v2 = vpop.permute.xlu0 %231 }
  0xa5   :  { %v237_v3 = vsel %vm36_vm1, %v230_v62, %v232_v2  ;;  %v238_v4 = vsel %vm36_vm1, %v232_v2, %v234_v1  ;;  %v426_v6 = vld [vmem:[#allocation2 + $0x90] sm:$0xff] }
  0xa6   :  { %243 = vst [vmem:[#allocation2 + $0x18] sm:$0xf0] %v237_v3  ;;  %244 = vst [vmem:[#allocation2 + $0x20] sm:$0xf0] %v238_v4  ;;  %v727_v7 = vpack.c.bf16 %v426_v6, %v420_v5 }
  0xa8   :  { %v253_v8 = vpop.permute.xlu1 %252  ;;  %v236_v9 = vpop.permute.xlu0 %235  ;;  %728 = vmatpush1.bf16.msra.mxu0 %v727_v7 }
  0xa9   :  { %v239_v10 = vsel %vm36_vm1, %v234_v1, %v236_v9  ;;  %v433_v11 = vld [vmem:[#allocation2 + $0xc8] sm:$0xf] }
  0xaa   :  { %245 = vst [vmem:[#allocation2 + $0x28] sm:$0xf0] %v239_v10  ;;  %709 = vmatprep.subr.msk.mxu0 %vm448_vm8, %v433_v11 }
  0xac   :  { %v257_v12 = vpop.permute.xlu1 %256  ;;  %v255_v13 = vpop.permute.xlu0 %254 }
  0xad   :  { %v260_v16 = vsel %vm60_vm0, %v253_v8, %v255_v13  ;;  %v261_v17 = vsel %vm60_vm0, %v255_v13, %v257_v12  ;;  %v411_v35 = vld [vmem:[#allocation2 + $0x18] sm:$0xff]  ;;  %v412_v58 = vld [vmem:[#allocation2 + $0x20] sm:$0xff] }
  0xae   :  { %266 = vst [vmem:[#allocation2 + $0x48] sm:$0xf] %v260_v16  ;;  %267 = vst [vmem:[#allocation2 + $0x50] sm:$0xf] %v261_v17 }
  0xb0   :  { %v276_v19 = vpop.permute.xlu1 %275  ;;  %v259_v20 = vpop.permute.xlu0 %258 }
  0xb1   :  { %v262_v22 = vsel %vm60_vm0, %v257_v12, %v259_v20  ;;  %v413_v53 = vld [vmem:[#allocation2 + $0x28] sm:$0xff] }
  0xb2   :  { %268 = vst [vmem:[#allocation2 + $0x58] sm:$0xf] %v262_v22 }
  0xb4   :  { %v280_v23 = vpop.permute.xlu1 %279  ;;  %v278_v24 = vpop.permute.xlu0 %277 }
  0xb5   :  { %v283_v25 = vsel %vm84_vm2, %v276_v19, %v278_v24  ;;  %v284_v26 = vsel %vm84_vm2, %v278_v24, %v280_v23 }
  0xb6   :  { %289 = vst [vmem:[#allocation2 + $0x48] sm:$0xf0] %v283_v25  ;;  %290 = vst [vmem:[#allocation2 + $0x50] sm:$0xf0] %v284_v26 }
  0xb8   :  { %v35_v27 = vpop.permute.xlu1 %34  ;;  %v282_v28 = vpop.permute.xlu0 %281 }
  0xb9   :  { %v39_v29 = vsel %vm36_vm1, %v926_v18, %v35_v27  ;;  %v285_v30 = vsel %vm84_vm2, %v280_v23, %v282_v28 }
  0xba   :  { %45 = vst [vmem:[#allocation2 + $0x10] sm:$0xf0] %v39_v29  ;;  %291 = vst [vmem:[#allocation2 + $0x58] sm:$0xf0] %v285_v30 }
  0xbc   :  { %v83_v31 = vpop.permute.xlu1 %82  ;;  %v59_v32 = vpop.permute.xlu0 %58 }
  0xbd   :  { %v87_v33 = vsel %vm84_vm2, %v935_v21, %v83_v31  ;;  %v63_v34 = vsel %vm60_vm0, %v920_v15, %v59_v32  ;;  %v417_v36 = vld [vmem:[#allocation2 + $0x48] sm:$0xff]  ;;  %v418_v50 = vld [vmem:[#allocation2 + $0x50] sm:$0xff] }
  0xbe   :  { %93 = vst [vmem:[#allocation2 + $0x40] sm:$0xf0] %v87_v33  ;;  %69 = vst [vmem:[#allocation2 + $0x40] sm:$0xf] %v63_v34  ;;  %v729_v38 = vpack.c.bf16 %v417_v36, %v411_v35  ;;  %v739_v59 = vpack.c.bf16 %v418_v50, %v412_v58 }
  0xc0   :  { %v299_v39 = vpop.permute.xlu1 %298  ;;  %730 = vmatprep.subr.bf16.mxu1 %v729_v38  ;;  %v197_v18 = vpop.permute.xlu0 %196 }
  0xc1   :  { %v205_v41 = vsel %vm204_vm7, %v197_v18, %v966_v56  ;;  %v410_v45 = vld [vmem:[#allocation2 + $0x10] sm:$0xff]  ;;  %v419_v48 = vld [vmem:[#allocation2 + $0x58] sm:$0xff] }
  0xc2   :  { %211 = vst [vmem:[#allocation2 + $0xc0] sm:$0xf] %v205_v41  ;;  %v737_v57 = vpack.c.bf16 %v419_v48, %v413_v53 }
  0xc4   :  { %v303_v42 = vpop.permute.xlu1 %302  ;;  %v301_v43 = vpop.permute.xlu0 %300 }
  0xc5   :  { %v306_v44 = vsel %vm108_vm3, %v299_v39, %v301_v43  ;;  %v307_v21 = vsel %vm108_vm3, %v301_v43, %v303_v42  ;;  %v416_v15 = vld [vmem:[#allocation2 + $0x40] sm:$0xff] }
  0xc6   :  { %312 = vst [vmem:[#allocation2 + $0x78] sm:$0xf] %v306_v44  ;;  %313 = vst [vmem:[#allocation2 + $0x80] sm:$0xf] %v307_v21  ;;  %v731_v47 = vpack.c.bf16 %v416_v15, %v410_v45 }
  0xc8   :  { %v322_v51 = vpop.permute.xlu1 %321  ;;  %v305_v52 = vpop.permute.xlu0 %304  ;;  %732 = vmatpush1.bf16.msra.mxu1 %v731_v47 }
  0xc9   :  { %v308_v55 = vsel %vm108_vm3, %v303_v42, %v305_v52  ;;  %v432_v56 = vld [vmem:[#allocation2 + $0xc0] sm:$0xf] }
  0xca   :  { %314 = vst [vmem:[#allocation2 + $0x88] sm:$0xf] %v308_v55  ;;  %710 = vmatpush1.msk.msra.mxu0 %vm448_vm8, %v432_v56 }
  0xcb   :  { %738 = vmatprep.subr.bf16.mxu0 %v737_v57  ;;  %711 = vmatmul.mubr.msk.f32.vlgmr.msra.gmra.mrb[0].mxu0 %vm444_vm9, %v997_v54 }
  0xcc   :  { %v326_v60 = vpop.permute.xlu1 %325  ;;  %v324_v61 = vpop.permute.xlu0 %323  ;;  %740 = vmatpush1.bf16.msra.mxu0 %v739_v59  ;;  %673 = vmatprep.mubr.f32.mxu0 %v772_v14 }
  0xcd   :  { %v329_v62 = vsel %vm132_vm4, %v322_v51, %v324_v61  ;;  %v330_v0 = vsel %vm132_vm4, %v324_v61, %v326_v60 }
  0xce   :  { %335 = vst [vmem:[#allocation2 + $0x78] sm:$0xf0] %v329_v62  ;;  %336 = vst [vmem:[#allocation2 + $0x80] sm:$0xf0] %v330_v0 }
  0xd0   :  { %v345_v1 = vpop.permute.xlu1 %344  ;;  %v328_v2 = vpop.permute.xlu0 %327 }
  0xd1   :  { %v331_v3 = vsel %vm132_vm4, %v326_v60, %v328_v2 }
  0xd2   :  { %337 = vst [vmem:[#allocation2 + $0x88] sm:$0xf0] %v331_v3 }
  0xd4   :  { %v349_v4 = vpop.permute.xlu1 %348  ;;  %v347_v5 = vpop.permute.xlu0 %346 }
  0xd5   :  { %v352_v6 = vsel %vm156_vm5, %v345_v1, %v347_v5  ;;  %v353_v7 = vsel %vm156_vm5, %v347_v5, %v349_v4  ;;  %v423_v26 = vld [vmem:[#allocation2 + $0x78] sm:$0xff] }
  0xd6   :  { %358 = vst [vmem:[#allocation2 + $0xa8] sm:$0xf] %v352_v6  ;;  %359 = vst [vmem:[#allocation2 + $0xb0] sm:$0xf] %v353_v7 }
  0xd8   :  { %v368_v14 = vpop.permute.xlu1 %367  ;;  %v351_v8 = vpop.permute.xlu0 %350 }
  0xd9   :  { %v354_v9 = vsel %vm156_vm5, %v349_v4, %v351_v8  ;;  %v425_v32 = vld [vmem:[#allocation2 + $0x88] sm:$0xff] }
  0xda   :  { %360 = vst [vmem:[#allocation2 + $0xb8] sm:$0xf] %v354_v9 }
  0xdc   :  { %v372_v10 = vpop.permute.xlu1 %371  ;;  %v370_v11 = vpop.permute.xlu0 %369 }
  0xdd   :  { %v375_v12 = vsel %vm180_vm6, %v368_v14, %v370_v11  ;;  %v376_v13 = vsel %vm180_vm6, %v370_v11, %v372_v10 }
  0xde   :  { %381 = vst [vmem:[#allocation2 + $0xa8] sm:$0xf0] %v375_v12  ;;  %382 = vst [vmem:[#allocation2 + $0xb0] sm:$0xf0] %v376_v13 }
  0xe0   :  { %v107_v16 = vpop.permute.xlu1 %106  ;;  %v374_v17 = vpop.permute.xlu0 %373 }
  0xe1   :  { %v111_v19 = vsel %vm108_vm3, %v947_v37, %v107_v16  ;;  %v377_v20 = vsel %vm180_vm6, %v372_v10, %v374_v17 }
  0xe2   :  { %117 = vst [vmem:[#allocation2 + $0x70] sm:$0xf] %v111_v19  ;;  %383 = vst [vmem:[#allocation2 + $0xb8] sm:$0xf0] %v377_v20 }
  0xe4   :  { %v155_v22 = vpop.permute.xlu1 %154  ;;  %v131_v23 = vpop.permute.xlu0 %130 }
  0xe5   :  { %v159_v24 = vsel %vm156_vm5, %v955_v46, %v155_v22  ;;  %v135_v25 = vsel %vm132_vm4, %v951_v40, %v131_v23  ;;  %v429_v27 = vld [vmem:[#allocation2 + $0xa8] sm:$0xff]  ;;  %v430_v37 = vld [vmem:[#allocation2 + $0xb0] sm:$0xff]  ;;  %v424_v46 = vld [vmem:[#allocation2 + $0x80] sm:$0xff] }
  0xe6   :  { %165 = vst [vmem:[#allocation2 + $0xa0] sm:$0xf] %v159_v24  ;;  %141 = vst [vmem:[#allocation2 + $0x70] sm:$0xf0] %v135_v25  ;;  %v733_v28 = vpack.c.bf16 %v429_v27, %v423_v26  ;;  %v743_v35 = vpack.c.bf16 %v430_v37, %v424_v46 }
  0xe8   :  { %v391_v29 = vpop.permute.xlu1 %390  ;;  %v179_v30 = vpop.permute.xlu0 %178  ;;  %734 = vmatprep.subr.bf16.mxu1 %v733_v28 }
  0xe9   :  { %v183_v31 = vsel %vm180_vm6, %v959_v49, %v179_v30  ;;  %v431_v33 = vld [vmem:[#allocation2 + $0xb8] sm:$0xff] }
  0xea   :  { %189 = vst [vmem:[#allocation2 + $0xa0] sm:$0xf0] %v183_v31  ;;  %v741_v34 = vpack.c.bf16 %v431_v33, %v425_v32 }
  0xec   :  { %v395_v36 = vpop.permute.xlu1 %394  ;;  %v393_v40 = vpop.permute.xlu0 %392  ;;  %742 = vmatprep.subr.bf16.mxu0 %v741_v34 }
  0xed   :  { %v398_v38 = vsel %vm204_vm7, %v391_v29, %v393_v40  ;;  %v399_v39 = vsel %vm204_vm7, %v393_v40, %v395_v36  ;;  %744 = vmatpush1.bf16.msra.mxu0 %v743_v35  ;;  %v422_v43 = vld [vmem:[#allocation2 + $0x70] sm:$0xff] }
  0xee   :  { %404 = vst [vmem:[#allocation2 + $0xd8] sm:$0xf] %v398_v38  ;;  %405 = vst [vmem:[#allocation2 + $0xe0] sm:$0xf] %v399_v39 }
  0xf0   :  { %v203_v18 = vpop.permute.xlu1 %202  ;;  %v397_v41 = vpop.permute.xlu0 %396 }
  0xf1   :  { %v207_v49 = vsel %vm204_vm7, %v969_v63, %v203_v18  ;;  %v400_v42 = vsel %vm204_vm7, %v395_v36, %v397_v41  ;;  %v428_v44 = vld [vmem:[#allocation2 + $0xa0] sm:$0xff] }
  0xf2   :  { %213 = vst [vmem:[#allocation2 + $0xd0] sm:$0xf] %v207_v49  ;;  %406 = vst [vmem:[#allocation2 + $0xe8] sm:$0xf] %v400_v42  ;;  %v735_v21 = vpack.c.bf16 %v428_v44, %v422_v43 }
  0xf4   :  { %736 = vmatpush1.bf16.msra.mxu1 %v735_v21 }
  0xf5   :  { %v435_v45 = vld [vmem:[#allocation2 + $0xd8] sm:$0xf]  ;;  %v436_v48 = vld [vmem:[#allocation2 + $0xe0] sm:$0xf] }
  0xf6   :  { %712 = vmatprep.subr.msk.mxu1 %vm448_vm8, %v435_v45 }
  0xf9   :  { %v434_v15 = vld [vmem:[#allocation2 + $0xd0] sm:$0xf]  ;;  %v437_v47 = vld [vmem:[#allocation2 + $0xe8] sm:$0xf] }
  0xfa   :  { %713 = vmatpush1.msk.msra.mxu1 %vm448_vm8, %v434_v15  ;;  %715 = vmatprep.subr.msk.mxu0 %vm448_vm8, %v437_v47 }
  0xfb   :  { %714 = vmatmul.mubr.msk.f32.vlgmr.msra.gmra.mrb[0].mxu1 %vm444_vm9, %v997_v54  ;;  %716 = vmatpush1.msk.msra.mxu0 %vm448_vm8, %v436_v48 }
  0xfc   :  { %717 = vmatmul.mubr.msk.f32.vlgmr.msra.gmra.mrb[2].mxu0 %vm444_vm9, %v997_v54 }
 0x101   :  { %v442_v63 = vpop.permute.xlu0 %441 }
 0x19e   :  { %v533_v50 = vpop.f32.mrb[0].mxu0 }
 0x19f   :  { %v534_v51 = vadd.f32 %v533_v50, %v442_v63  ;;  %v535_v52 = vpop.f32.mrb[1].mxu0 }
 0x1a0   :  { %v536_v53 = vadd.f32 %v535_v52, %v442_v63 }
 0x1a1   :  { %680 = vst [vmem:[%s1055_s3] sm:$0xff] %v534_v51 }
 0x1a2   :  { %681 = vst [vmem:[%s1055_s3 + $0x8] sm:$0xff] %v536_v53 }
 0x1ce   :  { %v604_v55 = vpop.f32.mrb[0].mxu1 }
 0x1cf   :  { %v605_v56 = vadd.f32 %v604_v55, %v442_v63  ;;  %v606_v57 = vpop.f32.mrb[1].mxu1  ;;  %v675_v58 = vpop.f32.mrb[2].mxu0 }
 0x1d0   :  { %v607_v59 = vadd.f32 %v606_v57, %v442_v63  ;;  %v676_v60 = vadd.f32 %v675_v58, %v442_v63  ;;  %v677_v54 = vpop.f32.mrb[3].mxu0 }
 0x1d1   :  { %682 = vst [vmem:[%s1055_s3 + $0x10] sm:$0xff] %v605_v56  ;;  %v678_v61 = vadd.f32 %v677_v54, %v442_v63 }
 0x1d2   :  { %718 = vst [vmem:[%s1055_s3 + $0x18] sm:$0xff] %v607_v59  ;;  %719 = vst [vmem:[%s1055_s3 + $0x20] sm:$0xff] %v676_v60 }
 0x1d3   :  { %720 = vst [vmem:[%s1055_s3 + $0x28] sm:$0xff] %v678_v61 }

</bundles_post_ra>
